<compile_context>
chip_gen: v6e
topology: v6e:2x2x1
jax: 0.10.0
libtpu: 0.0.40
codegen_flags: <defaults>
</compile_context>

<pallas_src>
import functools

import jax
import jax.numpy as jnp
from jax.experimental import pallas as pl
from jax.experimental.pallas import tpu as pltpu


_IGNORE_INDEX = -100                       # torch.nn.CrossEntropyLoss default
_LOGITS_BUF_BUDGET = 4 * 1024 * 1024       # bytes per pipelined logits buffer
_VMEM_LIMIT = 32 * 1024 * 1024             # fits v7x (64 MiB) and v5e/v6e


def _round_up(x, m):
    return (x + m - 1) // m * m


def _ce_loss_kernel(gt_ref, x_ref, out_ref, m_sc, l_sc, p_sc, *,
                    num_classes, mask_classes):
    """Grid = (batch tiles, class tiles); class axis is an online-LSE reduction."""
    k = pl.program_id(1)
    block_c = x_ref.shape[1]

    @pl.when(k == 0)
    def _():
        m_sc[...] = jnp.full_like(m_sc, -jnp.inf)   # running max
        l_sc[...] = jnp.zeros_like(l_sc)            # running sum(exp)
        p_sc[...] = jnp.zeros_like(p_sc)            # picked target logit

    x = x_ref[...].astype(jnp.float32)              # (block_n, block_c), f32 math
    gt = gt_ref[...]                                # (block_n, 1) int32

    # Global class id of every lane in this class tile.
    lane = jax.lax.broadcasted_iota(jnp.int32, x.shape, 1) + k * block_c

    # Accumulate the logit at the target class via a one-hot mask
    # (no dynamic gather on TPU).  Valid targets are always < num_classes, so
    # padded lanes can never match.
    p_sc[...] += jnp.sum(jnp.where(lane == gt, x, 0.0), axis=-1, keepdims=True)

    if mask_classes:
        # Last class tile extends past C: neutralize padded lanes for the LSE.
        x = jnp.where(lane < num_classes, x, -jnp.inf)

    # Numerically stable online logsumexp update.
    m_prev = m_sc[...]
    m_new = jnp.maximum(m_prev, jnp.max(x, axis=-1, keepdims=True))
    l_sc[...] = (l_sc[...] * jnp.exp(m_prev - m_new)
                 + jnp.sum(jnp.exp(x - m_new), axis=-1, keepdims=True))
    m_sc[...] = m_new

    @pl.when(k == pl.num_programs(1) - 1)
    def _():
        loss = (m_sc[...] + jnp.log(l_sc[...])) - p_sc[...]
        # ignore_index semantics (reduction='none' -> loss 0 at ignored targets)
        loss = jnp.where(gt == _IGNORE_INDEX, 0.0, loss)
        out_ref[...] = loss.astype(out_ref.dtype)


def _choose_tiles(N, C, elem_bytes):
    """VMEM-budgeted (block_n, block_c): block_n % 8 == 0; block_c == C or %128."""
    # Class tile: full C if an (8, C) row strip fits the budget; otherwise the
    # largest 128-multiple within budget (no divisibility requirement — the
    # kernel masks the padded lanes of the last class tile).
    max_c = max(128, _LOGITS_BUF_BUDGET // (8 * elem_bytes))
    block_c = C if C <= max_c else (max_c // 128) * 128
    # Batch tile: multiple of 8 rows keeping the logits tile within budget.
    block_n = max(8, (_LOGITS_BUF_BUDGET // (block_c * elem_bytes)) // 8 * 8)
    block_n = min(block_n, 1024)            # keep >1 grid step on realistic N
    block_n = min(block_n, _round_up(N, 8))
    return block_n, block_c


def ce_loss(out, gt_index, *, block_n=None, block_c=None):
    """Cross-entropy with reduction='none'. out: (N, C) logits, gt_index: (N,)."""
    N, C = out.shape
    elem_bytes = jnp.dtype(out.dtype).itemsize

    auto_n, auto_c = _choose_tiles(N, C, elem_bytes)
    if block_n is None:
        block_n = auto_n
    if block_c is None:
        block_c = auto_c
    assert block_n % 8 == 0, "block_n must be a multiple of 8"
    assert block_c == C or block_c % 128 == 0, "block_c must be C or a 128-multiple"

    n_tiles = pl.cdiv(N, block_n)
    c_tiles = pl.cdiv(C, block_c)
    n_pad = n_tiles * block_n
    mask_classes = (block_c != C) and (C % block_c != 0)

    # gt is tiny: pad it with ignore_index so edge rows are deterministic.
    # Logits are NOT padded/copied — the last batch tile uses Pallas edge
    # masking (rows >= N read undefined data, are row-independent, and the
    # corresponding outputs are sliced away), saving a full HBM round trip.
    gt2d = gt_index.astype(jnp.int32).reshape(N, 1)
    if n_pad != N:
        gt2d = jnp.pad(gt2d, ((0, n_pad - N), (0, 0)),
                       constant_values=_IGNORE_INDEX)

    kernel = functools.partial(_ce_loss_kernel,
                               num_classes=C, mask_classes=mask_classes)

    cost = pl.CostEstimate(
        flops=7 * N * C,
        transcendentals=N * C,
        bytes_accessed=N * C * elem_bytes + N * 8,
    )

    loss2d = pl.pallas_call(
        kernel,
        out_shape=jax.ShapeDtypeStruct((n_pad, 1), jnp.float32),
        grid_spec=pltpu.PrefetchScalarGridSpec(
            num_scalar_prefetch=0,
            grid=(n_tiles, c_tiles),
            in_specs=[
                pl.BlockSpec((block_n, 1), lambda i, k: (i, 0)),        # gt
                pl.BlockSpec((block_n, block_c), lambda i, k: (i, k)),  # logits
            ],
            out_specs=pl.BlockSpec((block_n, 1), lambda i, k: (i, 0)),
            scratch_shapes=[
                pltpu.VMEM((block_n, 1), jnp.float32),   # running max
                pltpu.VMEM((block_n, 1), jnp.float32),   # running sum(exp)
                pltpu.VMEM((block_n, 1), jnp.float32),   # picked target logit
            ],
        ),
        compiler_params=pltpu.CompilerParams(
            dimension_semantics=("parallel", "arbitrary"),
            vmem_limit_bytes=_VMEM_LIMIT,
        ),
        cost_estimate=cost,
    )(gt2d, out)

    return loss2d[:N, 0]


if __name__ == "__main__":
    key = jax.random.PRNGKey(0)
    k1, k2, k3, k4, k5, k6 = jax.random.split(key, 6)

    # Case 1: small shapes matching the module's forward (N, C) / (N,).
    N, C = 8, 32
    logits = jax.random.normal(k1, (N, C), dtype=jnp.float32)
    gt = jax.random.randint(k2, (N,), 0, C, dtype=jnp.int32)
    loss = ce_loss(logits, gt)
    jax.block_until_ready(loss)
    ref = -jnp.take_along_axis(jax.nn.log_softmax(logits, axis=-1),
                               gt[:, None], axis=-1)[:, 0]
    assert loss.shape == (N,)
    assert jnp.allclose(loss, ref, atol=1e-5, rtol=1e-5), (loss, ref)

    # Case 2: class-axis tiling (online LSE across 2 class tiles), batch edge
    # block (N not a multiple of block_n, no HBM padding of logits), native
    # bf16 logits, and the ignore_index=-100 path.
    N2, C2 = 18, 256
    logits2 = jax.random.normal(k3, (N2, C2), dtype=jnp.bfloat16)
    gt2 = jax.random.randint(k4, (N2,), 0, C2, dtype=jnp.int32)
    gt2 = gt2.at[3].set(_IGNORE_INDEX)
    loss2 = ce_loss(logits2, gt2, block_n=8, block_c=128)
    jax.block_until_ready(loss2)
    lp2 = jax.nn.log_softmax(logits2.astype(jnp.float32), axis=-1)
    safe_gt2 = jnp.where(gt2 == _IGNORE_INDEX, 0, gt2)
    ref2 = -jnp.take_along_axis(lp2, safe_gt2[:, None], axis=-1)[:, 0]
    ref2 = jnp.where(gt2 == _IGNORE_INDEX, 0.0, ref2)
    assert loss2.shape == (N2,)
    assert jnp.allclose(loss2, ref2, atol=1e-3, rtol=1e-3), (loss2, ref2)

    # Case 3: C not a multiple of block_c -> padded class lanes masked in-kernel.
    N3, C3 = 16, 200
    logits3 = jax.random.normal(k5, (N3, C3), dtype=jnp.float32)
    gt3 = jax.random.randint(k6, (N3,), 0, C3, dtype=jnp.int32)
    loss3 = ce_loss(logits3, gt3, block_n=8, block_c=128)
    jax.block_until_ready(loss3)
    ref3 = -jnp.take_along_axis(jax.nn.log_softmax(logits3, axis=-1),
                                gt3[:, None], axis=-1)[:, 0]
    assert loss3.shape == (N3,)
    assert jnp.allclose(loss3, ref3, atol=1e-5, rtol=1e-5), (loss3, ref3)

    print("KERNEL_OK")
</pallas_src>

<mosaic_0001>
module attributes {stable_mosaic.version = 11 : i64} {
  func.func @_ce_loss_kernel(%arg0: i32, %arg1: i32, %arg2: memref<8x1xi32, #tpu.memory_space<vmem>>, %arg3: memref<8x32xf32, #tpu.memory_space<vmem>>, %arg4: memref<8x1xf32, #tpu.memory_space<vmem>>, %arg5: memref<8x1xf32, #tpu.memory_space<vmem>>, %arg6: memref<8x1xf32, #tpu.memory_space<vmem>>, %arg7: memref<8x1xf32, #tpu.memory_space<vmem>>) attributes {dimension_semantics = [#tpu.dimension_semantics<parallel>, #tpu.dimension_semantics<arbitrary>], iteration_bounds = array<i64: 1, 1>, scalar_prefetch = 0 : i64, scratch_operands = 3 : i64, tpu.core_type = #tpu.core_type<tc>, window_params = [{transform_indices = @transform_0, window_bounds = array<i64: 8, 1>}, {transform_indices = @transform_1, window_bounds = array<i64: 8, 32>}, {transform_indices = @transform_2, window_bounds = array<i64: 8, 1>}]} {
    %c0_i32 = arith.constant 0 : i32
    %0 = arith.cmpi eq, %arg1, %c0_i32 : i32
    %1 = arith.extui %0 : i1 to i32
    %c0_i32_0 = arith.constant 0 : i32
    %2 = arith.cmpi ne, %1, %c0_i32_0 : i32
    scf.if %2 {
      %cst_21 = arith.constant 0xFF800000 : f32
      %37 = vector.broadcast %cst_21 : f32 to vector<8x1xf32>
      %c0_22 = arith.constant 0 : index
      %c0_23 = arith.constant 0 : index
      %38 = vector.load %arg5[%c0_22, %c0_23] : memref<8x1xf32, #tpu.memory_space<vmem>>, vector<8x1xf32>
      tpu.vector_store %arg5[%c0_22, %c0_23], %37 {strides = array<i32>} : memref<8x1xf32, #tpu.memory_space<vmem>>, vector<8x1xf32>,
      %cst_24 = arith.constant 0.000000e+00 : f32
      %39 = vector.broadcast %cst_24 : f32 to vector<8x1xf32>
      %c0_25 = arith.constant 0 : index
      %c0_26 = arith.constant 0 : index
      %40 = vector.load %arg6[%c0_25, %c0_26] : memref<8x1xf32, #tpu.memory_space<vmem>>, vector<8x1xf32>
      tpu.vector_store %arg6[%c0_25, %c0_26], %39 {strides = array<i32>} : memref<8x1xf32, #tpu.memory_space<vmem>>, vector<8x1xf32>,
      %cst_27 = arith.constant 0.000000e+00 : f32
      %41 = vector.broadcast %cst_27 : f32 to vector<8x1xf32>
      %c0_28 = arith.constant 0 : index
      %c0_29 = arith.constant 0 : index
      %42 = vector.load %arg7[%c0_28, %c0_29] : memref<8x1xf32, #tpu.memory_space<vmem>>, vector<8x1xf32>
      tpu.vector_store %arg7[%c0_28, %c0_29], %41 {strides = array<i32>} : memref<8x1xf32, #tpu.memory_space<vmem>>, vector<8x1xf32>,
    } else {
    }
    %c0 = arith.constant 0 : index
    %c0_1 = arith.constant 0 : index
    %3 = vector.load %arg3[%c0, %c0_1] : memref<8x32xf32, #tpu.memory_space<vmem>>, vector<8x32xf32>
    %c0_2 = arith.constant 0 : index
    %c0_3 = arith.constant 0 : index
    %4 = vector.load %arg2[%c0_2, %c0_3] : memref<8x1xi32, #tpu.memory_space<vmem>>, vector<8x1xi32>
    %5 = tpu.iota {dimensions = array<i32: 1>} : vector<8x32xi32>
    %c32_i32 = arith.constant 32 : i32
    %6 = arith.muli %arg1, %c32_i32 : i32
    %7 = vector.broadcast %6 : i32 to vector<8x32xi32>
    %8 = arith.addi %5, %7 : vector<8x32xi32>
    %c0_4 = arith.constant 0 : index
    %c0_5 = arith.constant 0 : index
    %9 = vector.load %arg7[%c0_4, %c0_5] : memref<8x1xf32, #tpu.memory_space<vmem>>, vector<8x1xf32>
    %10 = vector.broadcast %4 : vector<8x1xi32> to vector<8x32xi32>
    %11 = arith.cmpi eq, %8, %10 : vector<8x32xi32>
    %cst = arith.constant 0.000000e+00 : f32
    %12 = vector.broadcast %cst : f32 to vector<8x32xf32>
    %13 = arith.select %11, %3, %12 : vector<8x32xi1>, vector<8x32xf32>
    %cst_6 = arith.constant dense<0.000000e+00> : vector<8xf32>
    %14 = vector.multi_reduction <add>, %13, %cst_6 [1] : vector<8x32xf32> to vector<8xf32>
    %15 = vector.shape_cast %14 : vector<8xf32> to vector<8x1xf32>
    %16 = arith.addf %9, %15 : vector<8x1xf32>
    %c0_7 = arith.constant 0 : index
    %c0_8 = arith.constant 0 : index
    %17 = vector.load %arg7[%c0_7, %c0_8] : memref<8x1xf32, #tpu.memory_space<vmem>>, vector<8x1xf32>
    tpu.vector_store %arg7[%c0_7, %c0_8], %16 {strides = array<i32>} : memref<8x1xf32, #tpu.memory_space<vmem>>, vector<8x1xf32>,
    %c0_9 = arith.constant 0 : index
    %c0_10 = arith.constant 0 : index
    %18 = vector.load %arg5[%c0_9, %c0_10] : memref<8x1xf32, #tpu.memory_space<vmem>>, vector<8x1xf32>
    %cst_11 = arith.constant dense<0xFF800000> : vector<8xf32>
    %19 = vector.multi_reduction <maximumf>, %3, %cst_11 [1] : vector<8x32xf32> to vector<8xf32>
    %20 = vector.shape_cast %19 : vector<8xf32> to vector<8x1xf32>
    %21 = arith.maximumf %18, %20 : vector<8x1xf32>
    %c0_12 = arith.constant 0 : index
    %c0_13 = arith.constant 0 : index
    %22 = vector.load %arg6[%c0_12, %c0_13] : memref<8x1xf32, #tpu.memory_space<vmem>>, vector<8x1xf32>
    %23 = arith.subf %18, %21 : vector<8x1xf32>
    %24 = math.exp %23 : vector<8x1xf32>
    %25 = arith.mulf %22, %24 : vector<8x1xf32>
    %26 = vector.broadcast %21 : vector<8x1xf32> to vector<8x32xf32>
    %27 = arith.subf %3, %26 : vector<8x32xf32>
    %28 = math.exp %27 : vector<8x32xf32>
    %cst_14 = arith.constant dense<0.000000e+00> : vector<8xf32>
    %29 = vector.multi_reduction <add>, %28, %cst_14 [1] : vector<8x32xf32> to vector<8xf32>
    %30 = vector.shape_cast %29 : vector<8xf32> to vector<8x1xf32>
    %31 = arith.addf %25, %30 : vector<8x1xf32>
    %c0_15 = arith.constant 0 : index
    %c0_16 = arith.constant 0 : index
    %32 = vector.load %arg6[%c0_15, %c0_16] : memref<8x1xf32, #tpu.memory_space<vmem>>, vector<8x1xf32>
    tpu.vector_store %arg6[%c0_15, %c0_16], %31 {strides = array<i32>} : memref<8x1xf32, #tpu.memory_space<vmem>>, vector<8x1xf32>,
    %c0_17 = arith.constant 0 : index
    %c0_18 = arith.constant 0 : index
    %33 = vector.load %arg5[%c0_17, %c0_18] : memref<8x1xf32, #tpu.memory_space<vmem>>, vector<8x1xf32>
    tpu.vector_store %arg5[%c0_17, %c0_18], %21 {strides = array<i32>} : memref<8x1xf32, #tpu.memory_space<vmem>>, vector<8x1xf32>,
    %c0_i32_19 = arith.constant 0 : i32
    %34 = arith.cmpi eq, %arg1, %c0_i32_19 : i32
    %35 = arith.extui %34 : i1 to i32
    %c0_i32_20 = arith.constant 0 : i32
    %36 = arith.cmpi ne, %35, %c0_i32_20 : i32
    scf.if %36 {
      %c0_21 = arith.constant 0 : index
      %c0_22 = arith.constant 0 : index
      %37 = vector.load %arg5[%c0_21, %c0_22] : memref<8x1xf32, #tpu.memory_space<vmem>>, vector<8x1xf32>
      %c0_23 = arith.constant 0 : index
      %c0_24 = arith.constant 0 : index
      %38 = vector.load %arg6[%c0_23, %c0_24] : memref<8x1xf32, #tpu.memory_space<vmem>>, vector<8x1xf32>
      %39 = math.log %38 : vector<8x1xf32>
      %40 = arith.addf %37, %39 : vector<8x1xf32>
      %c0_25 = arith.constant 0 : index
      %c0_26 = arith.constant 0 : index
      %41 = vector.load %arg7[%c0_25, %c0_26] : memref<8x1xf32, #tpu.memory_space<vmem>>, vector<8x1xf32>
      %42 = arith.subf %40, %41 : vector<8x1xf32>
      %c-100_i32 = arith.constant -100 : i32
      %43 = vector.broadcast %c-100_i32 : i32 to vector<8x1xi32>
      %44 = arith.cmpi eq, %4, %43 : vector<8x1xi32>
      %cst_27 = arith.constant 0.000000e+00 : f32
      %45 = vector.broadcast %cst_27 : f32 to vector<8x1xf32>
      %46 = arith.select %44, %45, %42 : vector<8x1xi1>, vector<8x1xf32>
      %c0_28 = arith.constant 0 : index
      %c0_29 = arith.constant 0 : index
      %47 = vector.load %arg4[%c0_28, %c0_29] : memref<8x1xf32, #tpu.memory_space<vmem>>, vector<8x1xf32>
      tpu.vector_store %arg4[%c0_28, %c0_29], %46 {strides = array<i32>} : memref<8x1xf32, #tpu.memory_space<vmem>>, vector<8x1xf32>,
    } else {
    }
    return
  }
  func.func @transform_0(%arg0: i32, %arg1: i32) -> (i32, i32) {
    %c0_i32 = arith.constant 0 : i32
    %c0_i32_0 = arith.constant 0 : i32
    return %arg0, %c0_i32 : i32, i32
  }
  func.func @transform_1(%arg0: i32, %arg1: i32) -> (i32, i32) {
    %c0_i32 = arith.constant 0 : i32
    return %arg0, %arg1 : i32, i32
  }
  func.func @transform_2(%arg0: i32, %arg1: i32) -> (i32, i32) {
    %c0_i32 = arith.constant 0 : i32
    %c0_i32_0 = arith.constant 0 : i32
    return %arg0, %c0_i32 : i32, i32
  }
}

</mosaic_0001>

<bundles_post_ra>
// kernel: tpu_custom_call.1
= control target key start
LH: loop header
LB: loop body
LE: loop exit
PB: predicated region body
PF: predicated region fallthrough
CT: control target
= control target key end

     0   :  { %vm32_vm0 = vcmask 261120   ;;  %vm15_vm1 = vcmask 7168   ;;  %v91_v1 = vmov -inf   ;;  %v92_v3 = vmov 0   ;;  %s128_s1 = inlined_call_operand.vmem [shape: f32[8,32], index: 1, kind: input, shape index: {}]   ;;  %s129_s0 = inlined_call_operand.vmem [shape: s32[8,1], index: 0, kind: input, shape index: {}]   ;;  %s130_s2 = inlined_call_operand.vmem [shape: f32[8,1], index: 2, kind: output, shape index: {}]  }
   0x1   :  { %v19_v0 = vld [vmem:[%s128_s1] sm:$0xff]  ;;  %16 = vst.msk [vmem:[#allocation2] sm:$0xff] %vm15_vm1, %v91_v1  ;;  %83 = vset.pattern.permute.xlu0 %v92_v3  ;;  %84 = vset.pattern.permute.xlu1 %v92_v3  ;;  %v93_v5 = vmov 0.0   ;;  %v21_v13 = vlaneseq }
   0x2   :  { %v40_v2 = vsel %vm32_vm0, %v19_v0, -inf  ;;  %v20_v4 = vld [vmem:[%s129_s0] sm:$0xff]  ;;  %17 = vst.msk [vmem:[#allocation3] sm:$0xff] %vm15_vm1, %v93_v5  ;;  %18 = vst.msk [vmem:[#allocation4] sm:$0xff] %vm15_vm1, %v93_v5 }
   0x3   :  { %41 = vmax.xlane.f32.xlu0 %v40_v2  ;;  %28 = vperm.xlu1 %84, %v20_v4   ;;  %v22_v14 = vand.u32 127, %v21_v13  ;;  %vm73_vm3 = vcmp.eq.s32.totalorder %v20_v4, 4294967196 }
   0x8   :  { %v39_v6 = vld [vmem:[#allocation2] sm:$0xff] }
   0x9   :  { %v44_v22 = vld [vmem:[#allocation3] sm:$0xff]  ;;  %v26_v26 = vld [vmem:[#allocation4] sm:$0xff] }
  0x7e   :  { %v29_v15 = vpop.permute.xlu1 %28 }
  0x7f   :  { %vm30_vm2 = vcmp.eq.s32.totalorder %v22_v14, %v29_v15 }
  0x80   :  { %v31_v17 = vsel %vm30_vm2, %v19_v0, 0.0 }
  0x81   :  { %v33_v19 = vsel %vm32_vm0, %v31_v17, 0.0 }
  0x8c   :  { %v42_v7 = vpop.xlane.xlu0 %41 }
  0x8d   :  { %v43_v8 = vmax.f32 %v39_v6, %v42_v7 }
  0x8f   :  { %v45_v9 = vsub.f32 %v39_v6, %v43_v8  ;;  %62 = vst.msk [vmem:[#allocation2] sm:$0xff] %vm15_vm1, %v43_v8  ;;  %51 = vperm.xlu0 %83, %v43_v8  }
  0x91   :  { %v46_v20 = vmul.f32 1.442695, %v45_v9 }
  0x96   :  { %v66_v32 = vld [vmem:[#allocation2] sm:$0xff] }
 0x10a   :  { %v52_v10 = vpop.permute.xlu0 %51 }
 0x10b   :  { %v54_v11 = vsub.f32 %v19_v0, %v52_v10 }
 0x10d   :  { %v55_v12 = vmul.f32 1.442695, %v54_v11 }
 0x10f   :  { %85 = vpow2.f32 %v55_v12 }
 0x110   :  { %87 = vpow2.f32 %v46_v20 }
 0x11c   :  { %v86_v16 = vpop.eup %85 }
 0x11d   :  { %v57_v18 = vsel %vm32_vm0, %v86_v16, 0.0  ;;  %v88_v21 = vpop.eup %87 }
 0x11e   :  { %58 = vadd.xlane.f32.xlu1 %v57_v18  ;;  %v48_v23 = vmul.f32 %v88_v21, %v44_v22 }
 0x122   :  { %34 = vadd.xlane.f32.xlu1 %v33_v19 }
 0x1a7   :  { %v59_v24 = vpop.xlane.xlu1 %58 }
 0x1a8   :  { %v60_v25 = vadd.f32 %v59_v24, %v48_v23 }
 0x1aa   :  { %61 = vst.msk [vmem:[#allocation3] sm:$0xff] %vm15_vm1, %v60_v25 }
 0x1ab   :  { %v35_v27 = vpop.xlane.xlu1 %34 }
 0x1ac   :  { %v36_v28 = vadd.f32 %v35_v27, %v26_v26 }
 0x1ae   :  { %38 = vst.msk [vmem:[#allocation4] sm:$0xff] %vm15_vm1, %v36_v28 }
 0x1b1   :  { %v67_v29 = vld [vmem:[#allocation3] sm:$0xff] }
 0x1b2   :  { %89 = vlog2.f32 %v67_v29 }
 0x1b5   :  { %v71_v33 = vld [vmem:[#allocation4] sm:$0xff] }
 0x1bf   :  { %v90_v30 = vpop.eup %89 }
 0x1c0   :  { %v69_v31 = vmul.f32 0.6931472, %v90_v30 }
 0x1c2   :  { %v70_v34 = vadd.f32 %v69_v31, %v66_v32 }
 0x1c4   :  { %v72_v35 = vsub.f32 %v70_v34, %v71_v33 }
 0x1c6   :  { %v74_v36 = vsel %vm73_vm3, 0.0, %v72_v35 }
 0x1c7   :  { %75 = vst.msk [vmem:[%s130_s2] sm:$0xff] %vm15_vm1, %v74_v36 }

</bundles_post_ra>
